<compile_context>
chip_gen: v7x
topology: tpu7x:2x2x1
jax: 0.10.0
libtpu: 0.0.40
codegen_flags: <defaults>
</compile_context>

<pallas_src>
import jax
import jax.numpy as jnp
from jax.experimental import pallas as pl
from jax.experimental.pallas import tpu as pltpu


def _round_up(x, m):
    return ((x + m - 1) // m) * m


def _custom_clip_kernel(scale_ref, x_ref, w_ref, t_ref, o_ref, acc_ref):
    """Fused encode (tiled over F) -> L2 normalize -> scaled similarity logits.

    scale_ref : SMEM (1,)       f32   logit_scale (pre-exp), scalar-prefetched
    x_ref     : VMEM (tB, tK)   bf16  flattened-image tile
    w_ref     : VMEM (tK, D)    bf16  stand-in encoder projection tile
    t_ref     : VMEM (D, Np)    f32   text embeddings, pre-transposed, resident
    o_ref     : VMEM (tB, Np)   f32   logits tile
    acc_ref   : VMEM (tB, D)    f32   feature accumulator (resident across K)
    """
    k = pl.program_id(1)

    @pl.when(k == 0)
    def _():
        acc_ref[...] = jnp.zeros_like(acc_ref)

    # Partial image-encoder matmul on the MXU, f32 accumulation.
    acc_ref[...] += jnp.dot(x_ref[...], w_ref[...],
                            preferred_element_type=jnp.float32)

    @pl.when(k == pl.num_programs(1) - 1)
    def _():
        feat = acc_ref[...]
        # image_features / image_features.norm(dim=-1, keepdim=True)
        sq = jnp.sum(feat * feat, axis=-1, keepdims=True)
        # tiny eps keeps zero-padded batch rows finite; no effect on real rows.
        inv_norm = jax.lax.rsqrt(sq + 1e-12)
        # fold logit_scale.exp() into the normalization (EUP ops, nearly free).
        scale = jnp.exp(scale_ref[0])
        feat_n = feat * (inv_norm * scale)
        # logits tile: straight MXU contraction against pre-transposed text.
        o_ref[...] = jnp.dot(feat_n, t_ref[...],
                             preferred_element_type=jnp.float32
                             ).astype(o_ref.dtype)


def custom_clip_forward(image_nchw, w_enc, text_encoding, logit_scale):
    """image_nchw: [B, C, H, W]; w_enc: [F=C*H*W, D]; text_encoding: [N, D]
    (row-normalized); logit_scale: (1,) pre-exp scalar. Returns [B, N] f32."""
    B = image_nchw.shape[0]
    F, D = w_enc.shape
    N = text_encoding.shape[0]

    # ---- tile / padding choices (lane = 128; bf16 sublane packing = 16) ----
    tB = 128 if B >= 128 else _round_up(B, 16)
    Bp = _round_up(B, tB)
    tK = min(512, _round_up(F, 128))
    Fp = _round_up(F, tK)
    Np = _round_up(N, 128)

    # ---- wrapper-side layout plumbing (free vs. in-kernel relayout) ----
    x = image_nchw.reshape(B, F)
    x = jnp.pad(x, ((0, Bp - B), (0, Fp - F))).astype(jnp.bfloat16)
    w = jnp.pad(w_enc, ((0, Fp - F), (0, 0))).astype(jnp.bfloat16)
    t = jnp.pad(text_encoding.astype(jnp.float32), ((0, Np - N), (0, 0))).T  # [D, Np]
    scale = logit_scale.astype(jnp.float32).reshape((1,))

    grid = (Bp // tB, Fp // tK)

    # VMEM budget: double-buffered x/w tiles + resident acc + resident text
    # + double-buffered out tile, with generous headroom.
    est = (2 * tB * tK * 2 + 2 * tK * D * 2
           + tB * D * 4 + D * Np * 4 + 2 * tB * Np * 4)
    vmem_limit = int(min(48 * 2**20, max(16 * 2**20, 4 * est)))

    out = pl.pallas_call(
        _custom_clip_kernel,
        out_shape=jax.ShapeDtypeStruct((Bp, Np), jnp.float32),
        grid_spec=pltpu.PrefetchScalarGridSpec(
            num_scalar_prefetch=1,                      # logit_scale -> SMEM
            grid=grid,
            in_specs=[
                pl.BlockSpec((tB, tK), lambda b, k, s: (b, k)),   # x tile
                pl.BlockSpec((tK, D), lambda b, k, s: (k, 0)),    # w tile
                pl.BlockSpec((D, Np), lambda b, k, s: (0, 0)),    # text^T (resident)
            ],
            out_specs=pl.BlockSpec((tB, Np), lambda b, k, s: (b, 0)),
            scratch_shapes=[pltpu.VMEM((tB, D), jnp.float32)],
        ),
        compiler_params=pltpu.CompilerParams(
            dimension_semantics=("parallel", "arbitrary"),
            vmem_limit_bytes=vmem_limit,
        ),
    )(scale, x, w, t)

    return out[:B, :N]


def reference_forward(image_nchw, w_enc, text_encoding, logit_scale):
    B = image_nchw.shape[0]
    x = image_nchw.reshape(B, -1).astype(jnp.float32)
    feat = x @ w_enc
    feat = feat / jnp.linalg.norm(feat, axis=-1, keepdims=True)
    return jnp.exp(logit_scale[0]) * feat @ text_encoding.T


if __name__ == "__main__":
    key = jax.random.PRNGKey(0)
    k_img, k_w, k_txt = jax.random.split(key, 3)

    # Small shapes consistent with the module's forward.
    B, C, H, W = 2, 4, 16, 16        # image: NCHW
    D = 128                          # embedding dim
    N = 16                           # number of categories (text embeddings)
    F = C * H * W

    image = jax.random.normal(k_img, (B, C, H, W), dtype=jnp.float32)

    # Deterministic synthetic stand-in encoder projection.
    w_enc = jax.random.normal(k_w, (F, D), dtype=jnp.float32) * (1.0 / jnp.sqrt(F))

    # text_encoding as produced by build_text_embedding: row-normalized [N, D].
    text_raw = jax.random.normal(k_txt, (N, D), dtype=jnp.float32)
    text_encoding = text_raw / jnp.linalg.norm(text_raw, axis=-1, keepdims=True)

    # CLIP default logit_scale init: log(1 / 0.07).
    logit_scale = jnp.array([jnp.log(1.0 / 0.07)], dtype=jnp.float32)

    logits = custom_clip_forward(image, w_enc, text_encoding, logit_scale)
    logits = jax.block_until_ready(logits)

    ref = reference_forward(image, w_enc, text_encoding, logit_scale)
    assert logits.shape == (B, N), logits.shape
    # bf16 x/w casts vs f32 reference -> loosened tolerance.
    assert jnp.allclose(logits, ref, atol=5e-2, rtol=5e-2), (
        float(jnp.max(jnp.abs(logits - ref)))
    )
    print("KERNEL_OK")
</pallas_src>

<mosaic_0001>
module attributes {stable_mosaic.version = 11 : i64} {
  func.func @_custom_clip_kernel(%arg0: i32, %arg1: i32, %arg2: memref<1xf32, #tpu.memory_space<smem>>, %arg3: memref<16x512xbf16, #tpu.memory_space<vmem>>, %arg4: memref<512x128xbf16, #tpu.memory_space<vmem>>, %arg5: memref<128x128xf32, #tpu.memory_space<vmem>>, %arg6: memref<16x128xf32, #tpu.memory_space<vmem>>, %arg7: memref<16x128xf32, #tpu.memory_space<vmem>>) attributes {dimension_semantics = [#tpu.dimension_semantics<parallel>, #tpu.dimension_semantics<arbitrary>], iteration_bounds = array<i64: 1, 2>, scalar_prefetch = 1 : i64, scratch_operands = 1 : i64, tpu.core_type = #tpu.core_type<tc>, window_params = [{transform_indices = @transform_0, window_bounds = array<i64: 16, 512>}, {transform_indices = @transform_1, window_bounds = array<i64: 512, 128>}, {pipeline_mode = #tpu.pipeline_mode<synchronous>, transform_indices = @transform_2, window_bounds = array<i64: 128, 128>}, {transform_indices = @transform_3, window_bounds = array<i64: 16, 128>}]} {
    %c0_i32 = arith.constant 0 : i32
    %0 = arith.cmpi eq, %arg1, %c0_i32 : i32
    %1 = arith.extui %0 : i1 to i32
    %c0_i32_0 = arith.constant 0 : i32
    %2 = arith.cmpi ne, %1, %c0_i32_0 : i32
    scf.if %2 {
      %cst_9 = arith.constant 0.000000e+00 : f32
      %12 = vector.broadcast %cst_9 : f32 to vector<16x128xf32>
      %c0_10 = arith.constant 0 : index
      %c0_11 = arith.constant 0 : index
      %13 = vector.load %arg7[%c0_10, %c0_11] : memref<16x128xf32, #tpu.memory_space<vmem>>, vector<16x128xf32>
      tpu.vector_store %arg7[%c0_10, %c0_11], %12 {strides = array<i32>} : memref<16x128xf32, #tpu.memory_space<vmem>>, vector<16x128xf32>,
    } else {
    }
    %c0 = arith.constant 0 : index
    %c0_1 = arith.constant 0 : index
    %3 = vector.load %arg7[%c0, %c0_1] : memref<16x128xf32, #tpu.memory_space<vmem>>, vector<16x128xf32>
    %c0_2 = arith.constant 0 : index
    %c0_3 = arith.constant 0 : index
    %4 = vector.load %arg3[%c0_2, %c0_3] : memref<16x512xbf16, #tpu.memory_space<vmem>>, vector<16x512xbf16>
    %c0_4 = arith.constant 0 : index
    %c0_5 = arith.constant 0 : index
    %5 = vector.load %arg4[%c0_4, %c0_5] : memref<512x128xbf16, #tpu.memory_space<vmem>>, vector<512x128xbf16>
    %cst = arith.constant dense<0.000000e+00> : vector<16x128xf32>
    %6 = tpu.matmul %4, %5, %cst {dimension_numbers = #tpu.dot_dimension_numbers<[1], [0], [0], [1], [0, 0, 1, 1], [], []>} : vector<16x512xbf16>, vector<512x128xbf16>, vector<16x128xf32> -> vector<16x128xf32>
    %7 = arith.addf %3, %6 : vector<16x128xf32>
    %c0_6 = arith.constant 0 : index
    %c0_7 = arith.constant 0 : index
    %8 = vector.load %arg7[%c0_6, %c0_7] : memref<16x128xf32, #tpu.memory_space<vmem>>, vector<16x128xf32>
    tpu.vector_store %arg7[%c0_6, %c0_7], %7 {strides = array<i32>} : memref<16x128xf32, #tpu.memory_space<vmem>>, vector<16x128xf32>,
    %c1_i32 = arith.constant 1 : i32
    %9 = arith.cmpi eq, %arg1, %c1_i32 : i32
    %10 = arith.extui %9 : i1 to i32
    %c0_i32_8 = arith.constant 0 : i32
    %11 = arith.cmpi ne, %10, %c0_i32_8 : i32
    scf.if %11 {
      %c0_9 = arith.constant 0 : index
      %c0_10 = arith.constant 0 : index
      %12 = vector.load %arg7[%c0_9, %c0_10] : memref<16x128xf32, #tpu.memory_space<vmem>>, vector<16x128xf32>
      %13 = arith.mulf %12, %12 : vector<16x128xf32>
      %cst_11 = arith.constant dense<0.000000e+00> : vector<16xf32>
      %14 = vector.multi_reduction <add>, %13, %cst_11 [1] : vector<16x128xf32> to vector<16xf32>
      %15 = vector.shape_cast %14 : vector<16xf32> to vector<16x1xf32>
      %cst_12 = arith.constant 9.99999996E-13 : f32
      %16 = vector.broadcast %cst_12 : f32 to vector<16x1xf32>
      %17 = arith.addf %15, %16 : vector<16x1xf32>
      %18 = math.rsqrt %17 : vector<16x1xf32>
      %c0_13 = arith.constant 0 : index
      %19 = memref.load %arg2[%c0_13] : memref<1xf32, #tpu.memory_space<smem>>
      %20 = math.exp %19 : f32
      %21 = vector.broadcast %20 : f32 to vector<16x1xf32>
      %22 = arith.mulf %18, %21 : vector<16x1xf32>
      %23 = vector.broadcast %22 : vector<16x1xf32> to vector<16x128xf32>
      %24 = arith.mulf %12, %23 : vector<16x128xf32>
      %c0_14 = arith.constant 0 : index
      %c0_15 = arith.constant 0 : index
      %25 = vector.load %arg5[%c0_14, %c0_15] : memref<128x128xf32, #tpu.memory_space<vmem>>, vector<128x128xf32>
      %cst_16 = arith.constant dense<0.000000e+00> : vector<16x128xf32>
      %26 = tpu.matmul %24, %25, %cst_16 {dimension_numbers = #tpu.dot_dimension_numbers<[1], [0], [0], [1], [0, 0, 1, 1], [], []>} : vector<16x128xf32>, vector<128x128xf32>, vector<16x128xf32> -> vector<16x128xf32>
      %c0_17 = arith.constant 0 : index
      %c0_18 = arith.constant 0 : index
      %27 = vector.load %arg6[%c0_17, %c0_18] : memref<16x128xf32, #tpu.memory_space<vmem>>, vector<16x128xf32>
      tpu.vector_store %arg6[%c0_17, %c0_18], %26 {strides = array<i32>} : memref<16x128xf32, #tpu.memory_space<vmem>>, vector<16x128xf32>,
    } else {
    }
    return
  }
  func.func @transform_0(%arg0: i32, %arg1: i32, %arg2: memref<1xf32, #tpu.memory_space<smem>>) -> (i32, i32) {
    %c0_i32 = arith.constant 0 : i32
    return %arg0, %arg1 : i32, i32
  }
  func.func @transform_1(%arg0: i32, %arg1: i32, %arg2: memref<1xf32, #tpu.memory_space<smem>>) -> (i32, i32) {
    %c0_i32 = arith.constant 0 : i32
    %c0_i32_0 = arith.constant 0 : i32
    return %arg1, %c0_i32 : i32, i32
  }
  func.func @transform_2(%arg0: i32, %arg1: i32, %arg2: memref<1xf32, #tpu.memory_space<smem>>) -> (i32, i32) {
    %c0_i32 = arith.constant 0 : i32
    %c0_i32_0 = arith.constant 0 : i32
    %c0_i32_1 = arith.constant 0 : i32
    return %c0_i32, %c0_i32_0 : i32, i32
  }
  func.func @transform_3(%arg0: i32, %arg1: i32, %arg2: memref<1xf32, #tpu.memory_space<smem>>) -> (i32, i32) {
    %c0_i32 = arith.constant 0 : i32
    %c0_i32_0 = arith.constant 0 : i32
    return %arg0, %c0_i32 : i32, i32
  }
}

</mosaic_0001>

<bundles_post_ra>
// kernel: tpu_custom_call.1
= control target key start
LH: loop header
LB: loop body
LE: loop exit
PB: predicated region body
PF: predicated region fallthrough
CT: control target
= control target key end

     0   :  { %s1672_s0 = inlined_call_operand.<no memory space> [shape: f32[1], index: 0, kind: input, shape index: {}]   ;;  %s1673_s1 = inlined_call_operand.hbm [shape: bf16[16,1024], index: 1, kind: input, shape index: {}]   ;;  %s1674_s2 = inlined_call_operand.hbm [shape: bf16[1024,128], index: 2, kind: input, shape index: {}]   ;;  %s1675_s3 = inlined_call_operand.hbm [shape: f32[128,128], index: 3, kind: input, shape index: {}]   ;;  %s1676_s4 = inlined_call_operand.hbm [shape: f32[16,128], index: 4, kind: output, shape index: {}]  }
   0x1   :  { %1681 = sst [smem:[#allocation16_spill]] %s1673_s1 }
   0x2   :  { %9 = sst [smem:[#allocation4]] %s1672_s0 }
   0x3   :  { %10 = vsyncpa [#allocation6], 0 }
   0x4   :  { %12 = vsyncpa [#allocation6 + $0x1], 0 }
   0x5   :  { %13 = vsyncpa [#allocation9], 0 }
   0x6   :  { %15 = vsyncpa [#allocation9 + $0x1], 0 }
   0x7   :  { %16 = vsyncpa [#allocation7], 0  ;;  %s1402_s17 = smov 0   ;;  %s1404_s18 = smov 0  }
   0x8   :  { %s1406_s19 = smov 0   ;;  %s1408_s20 = smov 0  }
   0x9   :  { %s1410_s21 = smov 0   ;;  %s1412_s22 = smov 0  }
   0xa LB: > { %s1431_s0 = sadd.s32 4294967295, %s1358_s22   ;;  %s43_s23 = sadd.s32 1, %s1346_s19  ;;  %s1358_s22 = sphi %s1412_s22, %s22_s22   ;;  %s1354_s21 = sphi %s1410_s21, %s1696_s21   ;;  %s1350_s20 = sphi %s1408_s20, %s1695_s20   ;;  %s1346_s19 = sphi %s1406_s19, %s1694_s19   ;;  %s1342_s18 = sphi %s1404_s18, %s1693_s18   ;;  %s1338_s17 = sphi %s1402_s17, %s1692_s17  }
   0xb   : > { %p50_p0 = scmp.ne.s32.totalorder %s1346_s19, %s1342_s18  ;;  %p51_p1 = scmp.eq.s32.totalorder %s1358_s22, 0 }
   0xc   : > { %p56_p2 = scmp.ne.s32.totalorder %s1342_s18, %s1338_s17  ;;  %p1677_p3 = scmp.eq.s32.totalorder %s1431_s0, 0 }
   0xd   : > { %p52_p4 = por %p51_p1, %p50_p0  ;;  %p862_p5 = scmp.ge.s32.totalorder %s1358_s22, 1 }
   0xe   : > { %p1442_p6 = por %p1677_p3, %p56_p2  ;;  %p140_p7 = scmp.lt.s32.totalorder %s1358_s22, 3 }
   0xf   : > { %s1360_s26 = smov [#allocation10]   ;;  %p1074_p10 = scmp.lt.s32.totalorder %s1358_s22, 2 }
  0x10   : > { %s1682_s24 = scalar_select %p1442_p6, 1, 0 }
  0x11   : > { %p1447_p8 = pnand %p862_p5, %p140_p7  ;;  %s152_s27 = sshll.u32 %s1360_s26, 4  ;;  %s153_s27 = int_to_ptr.vmem [resolvable:$true] %s152_s27 }
  0x12   : > { %p1460_p12 = pnand %p1074_p10, %p52_p4  ;;  %s31_s30 = sadd.s32 1, %s1354_s21 }
  0x13   : > { %s1683_s25 = scalar_select %p1447_p8, 1, 0 }
  0x14   : > { %p1062_p9 = pneg %p1447_p8  ;;  %s1182_s7 = scalar_lea.hbm %s1675_s3, 2048 }
  0x15   : > { %s1685_s29 = scalar_select %p1460_p12, 1, 0 }
  0x16   : > { %p1456_p11 = pnand %p1062_p9, %p1677_p3  ;;  %p1183_p13 = scmp.ne.s32.totalorder %s1675_s3, %s1182_s7 }
  0x17   : > { %p1189_p4 = scmp.lt.u32.totalorder %s1182_s7, %s1675_s3 }
  0x18   : > { %p1184_p0 = pneg %p1456_p11 }
  0x1a   : > { %p1185_p1 = pnand %p1184_p0, %p1183_p13 }
  0x1c   : > { %p1186_p2 = pneg %p1185_p1 }
  0x1e   : > { %p1191_p5 = pnand %p1189_p4, %p1186_p2 }
  0x20   : > { %1194 = shalt.err (!%p1191_p5)
}
  0x21   : > { %s1195_s12 = scalar_lea.vmem %s153_s27, 2048  ;;  %p1203_p3 = scmp.lt.s32.totalorder %s153_s27, %s153_s27 }
  0x22   : > { %p1196_p7 = scmp.ne.s32.totalorder %s153_s27, %s1195_s12  ;;  %p1204_p6 = scmp.lt.s32.totalorder %s1195_s12, %s1195_s12 }
  0x24   : > { %p1198_p9 = pnand %p1196_p7, %p1184_p0  ;;  %p1205_p8 = por %p1204_p6, %p1203_p3 }
  0x26   : > { %p1199_p10 = pneg %p1198_p9 }
  0x28   : > { %p1206_p12 = pnand %p1205_p8, %p1199_p10 }
  0x2a   : > { %1209 = shalt.err (!%p1206_p12)
}
  0x2b   : > { %s1361_s13 = smov 128   ;;  %s1362_s14 = smov 8  }
  0x2c   : > { %1065 = dma.hbm_to_vmem [thread:$0]  (!%p1456_p11), %s1675_s3, 2048, %s153_s27, [#allocation9], %s1361_s13, %s1361_s13, %s1362_s14  }
  0x2d   : > { %p32_p13 = scmp.ge.s32.totalorder %s31_s30, 2  ;;  %s1482_s17 = sand.u32 1, %s1346_s19  }
  0x2e   : > { %s917_s26 = sshll.u32 %s1354_s21, 8  ;;  %s865_s5 = sshll.u32 %s1482_s17, 5 }
  0x2f   : > { %s1698_s30 = smov (%p32_p13, %s31_s30), 0  ;;  %s1686_s1 = sld [smem:[#allocation16_spill]] }
  0x30   : > { %s39_s6 = ssub.s32 %s1354_s21, %s1698_s30  ;;  %s170_s27 = scalar_lea.vmem [#allocation5], %s865_s5 }
  0x31   : > { %p41_p3 = scmp.eq.s32.totalorder %s39_s6, 0  ;;  %s180_s9 = sshll.u32 %s170_s27, 4  ;;  %s1500_s9 = int_to_ptr.vmem [resolvable:$true] %s180_s9 }
  0x32   : > { %s190_s11 = sand.u32 1, %s1358_s22   ;;  %s167_s12 = scalar_lea.sflag [#allocation6], %s1482_s17 }
  0x33   : > { %s1498_s10 = scalar_select %p41_p3, %s1346_s19, %s43_s23  }
  0x34   : > { %p1687_p8 = scmp.ne.s32.totalorder %s1685_s29, 0 }
  0x35   : > { %s1493_s8 = scalar_lea.hbm %s1686_s1, %s917_s26  ;;  %s1215_s16 = scalar_lea.hbm %s1686_s1, 1024 }
  0x36   : > { %s1210_s13 = scalar_lea.hbm %s1493_s8, 512  ;;  %p1212_p11 = pneg %p1687_p8 }
  0x37   : > { %p1211_p6 = scmp.ne.s32.totalorder %s1493_s8, %s1210_s13  ;;  %p1216_p1 = scmp.lt.u32.totalorder %s1493_s8, %s1686_s1 }
  0x38   : > { %p1217_p2 = scmp.lt.u32.totalorder %s1215_s16, %s1210_s13  ;;  %p1219_p5 = scmp.lt.u32.totalorder %s1210_s13, %s1493_s8 }
  0x39   : > { %p1213_p12 = pnand %p1212_p11, %p1211_p6 }
  0x3a   : > { %p1218_p4 = por %p1217_p2, %p1216_p1 }
  0x3b   : > { %p1214_p0 = pneg %p1213_p12 }
  0x3c   : > { %p1220_p7 = por %p1219_p5, %p1218_p4 }
  0x3e   : > { %p1221_p9 = pnand %p1220_p7, %p1214_p0 }
  0x40   : > { %1224 = shalt.err (!%p1221_p9)
}
  0x41   : > { %s1225_s23 = scalar_lea.vmem %s1500_s9, 512  ;;  %s1363_s6 = smov [#allocation5]  }
  0x42   : > { %p1226_p10 = scmp.ne.s32.totalorder %s1500_s9, %s1225_s23  ;;  %s1230_s7 = sshll.u32 %s1363_s6, 4  ;;  %s1231_s7 = int_to_ptr.vmem [resolvable:$false] %s1230_s7 }
  0x43   : > { %s1232_s28 = scalar_lea.vmem %s1231_s7, 1024  ;;  %p1233_p6 = scmp.lt.s32.totalorder %s1500_s9, %s1231_s7 }
  0x44   : > { %p1228_p13 = pnand %p1226_p10, %p1212_p11  ;;  %p1234_p12 = scmp.lt.s32.totalorder %s1232_s28, %s1225_s23 }
  0x46   : > { %p1229_p3 = pneg %p1228_p13  ;;  %p1235_p1 = por %p1234_p12, %p1233_p6 }
  0x48   : > { %p1236_p2 = pnand %p1235_p1, %p1229_p3 }
  0x4a   : > { %1239 = shalt.err (!%p1236_p2)
}
  0x4b   : > { %s1364_s27 = smov 512   ;;  %s1365_s13 = smov 256  }
  0x4c   : > { %s1366_s14 = smov 16   ;;  %s868_s15 = sshll.u32 %s1482_s17, 8 }
  0x4d   : > { %1069 = dma.hbm_to_vmem [thread:$0]  (!%p1687_p8), %s1493_s8, 512, %s1500_s9, %s167_s12, %s1364_s27, %s1365_s13, %s1366_s14  }
  0x4e   : > { %s918_s16 = sshll.u32 %s1354_s21, 12  ;;  %s194_s6 = scalar_lea.vmem [#allocation8], %s868_s15 }
  0x4f   : > { %s1536_s23 = scalar_lea.hbm %s1674_s2, %s918_s16  ;;  %s201_s7 = sshll.u32 %s194_s6, 4  ;;  %s1538_s7 = int_to_ptr.vmem [resolvable:$true] %s201_s7 }
  0x50   : > { %s1542_s28 = scalar_lea.sflag [#allocation9], %s190_s11  ;;  %s1240_s1 = scalar_lea.hbm %s1536_s23, 4096 }
  0x51   : > { %p1241_p0 = scmp.ne.s32.totalorder %s1536_s23, %s1240_s1  ;;  %s1245_s9 = scalar_lea.hbm %s1674_s2, 8192 }
  0x52   : > { %p1246_p7 = scmp.lt.u32.totalorder %s1536_s23, %s1674_s2  ;;  %p1247_p9 = scmp.lt.u32.totalorder %s1245_s9, %s1240_s1 }
  0x53   : > { %p1243_p4 = pnand %p1241_p0, %p1212_p11  ;;  %p1249_p13 = scmp.lt.u32.totalorder %s1240_s1, %s1536_s23 }
  0x54   : > { %p1248_p10 = por %p1247_p9, %p1246_p7 }
  0x55   : > { %p1244_p5 = pneg %p1243_p4 }
  0x56   : > { %p1250_p3 = por %p1249_p13, %p1248_p10 }
  0x58   : > { %p1251_p6 = pnand %p1250_p3, %p1244_p5 }
  0x5a   : > { %1254 = shalt.err (!%p1251_p6)
}
  0x5b   : > { %s1255_s11 = scalar_lea.vmem %s1538_s7, 4096  ;;  %s1367_s13 = smov [#allocation8]  }
  0x5c   : > { %p1256_p12 = scmp.ne.s32.totalorder %s1538_s7, %s1255_s11  ;;  %s1260_s14 = sshll.u32 %s1367_s13, 4  ;;  %s1261_s14 = int_to_ptr.vmem [resolvable:$false] %s1260_s14 }
  0x5d   : > { %s1262_s15 = scalar_lea.vmem %s1261_s14, 8192  ;;  %p1263_p0 = scmp.lt.s32.totalorder %s1538_s7, %s1261_s14 }
  0x5e   : > { %p1258_p1 = pnand %p1256_p12, %p1212_p11  ;;  %p1264_p4 = scmp.lt.s32.totalorder %s1262_s15, %s1255_s11 }
  0x60   : > { %p1259_p2 = pneg %p1258_p1  ;;  %p1265_p7 = por %p1264_p4, %p1263_p0 }
  0x62   : > { %p1266_p9 = pnand %p1265_p7, %p1259_p2 }
  0x64   : > { %1269 = shalt.err (!%p1266_p9)
}
  0x65   : > { %s1368_s1 = smov 64   ;;  %s1369_s16 = smov 4  }
  0x66   : > { %1072 = dma.hbm_to_vmem [thread:$0]  (!%p1687_p8), %s1536_s23, 4096, %s1538_s7, %s1542_s28, %s1368_s1, %s1368_s1, %s1369_s16  }
  0x67   : > { %p1688_p11 = scmp.ne.s32.totalorder %s1683_s25, 0 }
  0x68   : > { %s215_s26 = sand.u32 (!%p1688_p11), 1, %s1342_s18   ;;  %p1689_p5 = scmp.ne.s32.totalorder (!%p1688_p11), %s1682_s24, 0 }
  0x69   : > { %213 = sbr.rel (%p1688_p11) target bundleno = 795 (0x31b), region = 32  ;;  %s872_s5 = sshll.u32 (!%p1688_p11), %s215_s26, 5 }
  0x6a   : > { %s216_s6 = scalar_lea.sflag (!%p1688_p11), [#allocation6], %s215_s26  ;;  %s1571_s17 = scalar_lea.vmem (!%p1688_p11), [#allocation5], %s872_s5 }
  0x70   : > { %1321 = dma.done.wait (%p1689_p5), %s216_s6, 512  }
  0x71   : > { %1323 = vsyncadd (%p1689_p5), %s216_s6, 4294966784  ;;  %s224_s8 = sand.u32 1, %s1431_s0   ;;  %s873_s29 = sshll.u32 %s215_s26, 8 }
  0x72   : > { %s225_s23 = scalar_lea.sflag [#allocation9], %s224_s8  ;;  %s1578_s7 = scalar_lea.vmem [#allocation8], %s873_s29 }
  0x73   : > { %1325 = dma.done.wait (%p1689_p5), %s225_s23, 4096  }
  0x74   : > { %1327 = vsyncadd (%p1689_p5), %s225_s23, 4294963200  ;;  %p1690_p8 = scmp.eq.s32.totalorder %s1431_s0, 0 }
  0x76   : > { %1329 = dma.done.wait (%p1690_p8), [#allocation9], 2048   ;;  %p1691_p10 = pmov %p1690_p8 }
  0x77   : > { %p875_p13 = scmp.ne.s32.totalorder %s1350_s20, 0 }
  0x78   : > { %1331 = vsyncadd (%p1691_p10), [#allocation9], 4294965248  ;;  %v1370_v0 = vmov (!%p875_p13), 0.0  }
  0x79   : > { %263 = sbr.rel (%p875_p13) target bundleno = 128 (0x80), region = 48  ;;  %264 = vst [vmem:[#allocation2] sm:$0xff] (!%p875_p13), %v1370_v0  ;;  %265 = vst [vmem:[#allocation2 + $0x8] sm:$0xff] (!%p875_p13), %v1370_v0 }
  0x80 PF: > { %v1138_v1 = vld [vmem:[%s1578_s7 + $0x40] sm:$0xff]   ;;  %v1142_v5 = vld [vmem:[%s1578_s7 + $0x48] sm:$0xff]   ;;  %v1146_v9 = vld [vmem:[%s1578_s7 + $0x50] sm:$0xff]   ;;  %p912_p3 = scmp.ne.s32.totalorder %s1350_s20, 1 }
  0x81   : > { %v1139_v2 = vld [vmem:[%s1578_s7 + $0xc0] sm:$0xff]   ;;  %919 = vmatprep.subr.bf16.mxu0 %v1138_v1  ;;  %v1143_v6 = vld [vmem:[%s1578_s7 + $0xc8] sm:$0xff]   ;;  %v1147_v10 = vld [vmem:[%s1578_s7 + $0xd0] sm:$0xff]   ;;  %s650_s24 = sld [smem:[#allocation4]] (!%p912_p3) }
  0x82   : > { %v1140_v3 = vld [vmem:[%s1578_s7] sm:$0xff]   ;;  %941 = vmatprep.subr.bf16.mxu1 %v1139_v2  ;;  %v1144_v7 = vld [vmem:[%s1578_s7 + $0x8] sm:$0xff]   ;;  %v1148_v11 = vld [vmem:[%s1578_s7 + $0x10] sm:$0xff]  }
  0x83   : > { %v1141_v4 = vld [vmem:[%s1578_s7 + $0x80] sm:$0xff]   ;;  %920 = vmatpush3.bf16.msra.mxu0 %v1140_v3  ;;  %v1145_v8 = vld [vmem:[%s1578_s7 + $0x88] sm:$0xff]   ;;  %v1149_v12 = vld [vmem:[%s1578_s7 + $0x90] sm:$0xff]  }
  0x84   : > { %942 = vmatpush3.bf16.msra.mxu1 %v1141_v4  ;;  %921 = vmatprep.subr.bf16.mxu0 %v1142_v5  ;;  %v1150_v13 = vld [vmem:[%s1578_s7 + $0x58] sm:$0xff]   ;;  %v1154_v17 = vld [vmem:[%s1578_s7 + $0x60] sm:$0xff]   ;;  %v1158_v21 = vld [vmem:[%s1578_s7 + $0x68] sm:$0xff]  }
  0x85   : > { %943 = vmatprep.subr.bf16.mxu1 %v1143_v6  ;;  %v1151_v14 = vld [vmem:[%s1578_s7 + $0xd8] sm:$0xff]   ;;  %v1155_v18 = vld [vmem:[%s1578_s7 + $0xe0] sm:$0xff]   ;;  %v1159_v22 = vld [vmem:[%s1578_s7 + $0xe8] sm:$0xff]  }
  0x86   : > { %v1152_v15 = vld [vmem:[%s1578_s7 + $0x18] sm:$0xff]   ;;  %v1156_v19 = vld [vmem:[%s1578_s7 + $0x20] sm:$0xff]   ;;  %v1160_v23 = vld [vmem:[%s1578_s7 + $0x28] sm:$0xff]  }
  0x87   : > { %922 = vmatpush3.bf16.msra.mxu0 %v1144_v7  ;;  %v1153_v16 = vld [vmem:[%s1578_s7 + $0x98] sm:$0xff]   ;;  %v1157_v20 = vld [vmem:[%s1578_s7 + $0xa0] sm:$0xff]   ;;  %v1161_v24 = vld [vmem:[%s1578_s7 + $0xa8] sm:$0xff]   ;;  %v651_v3 = vstv (!%p912_p3), %s650_s24 }
  0x88   : > { %944 = vmatpush3.bf16.msra.mxu1 %v1145_v8  ;;  %923 = vmatprep.subr.bf16.mxu0 %v1146_v9  ;;  %v1162_v25 = vld [vmem:[%s1578_s7 + $0x70] sm:$0xff]   ;;  %v1166_v29 = vld [vmem:[%s1578_s7 + $0x78] sm:$0xff]   ;;  %v660_v57 = vld [vmem:[#allocation10] sm:$0xff] (!%p912_p3)  ;;  %v652_v5 = vmul.f32 (!%p912_p3), 1.442695, %v651_v3 }
  0x89   : > { %945 = vmatprep.subr.bf16.mxu1 %v1147_v10  ;;  %v1163_v26 = vld [vmem:[%s1578_s7 + $0xf0] sm:$0xff]   ;;  %v1167_v30 = vld [vmem:[%s1578_s7 + $0xf8] sm:$0xff]   ;;  %v661_v59 = vld [vmem:[#allocation10 + $0x8] sm:$0xff] (!%p912_p3) }
  0x8a   : > { %v1164_v27 = vld [vmem:[%s1578_s7 + $0x30] sm:$0xff]   ;;  %v1168_v31 = vld [vmem:[%s1578_s7 + $0x38] sm:$0xff]   ;;  %v1016_v62 = vpack.c.bf16 (!%p912_p3), %v661_v59, %v660_v57  ;;  %v664_v1 = vld [vmem:[#allocation10 + $0x20] sm:$0xff] (!%p912_p3)  ;;  %1176 = vpow2.f32 (!%p912_p3), %v652_v5 }
  0x8b   : > { %924 = vmatpush3.bf16.msra.mxu0 %v1148_v11  ;;  %v1165_v28 = vld [vmem:[%s1578_s7 + $0xb0] sm:$0xff]   ;;  %v1169_v32 = vld [vmem:[%s1578_s7 + $0xb8] sm:$0xff]   ;;  %v665_v2 = vld [vmem:[#allocation10 + $0x28] sm:$0xff] (!%p912_p3) }
  0x8c   : > { %946 = vmatpush3.bf16.msra.mxu1 %v1149_v12  ;;  %925 = vmatprep.subr.bf16.mxu0 %v1150_v13  ;;  %v1170_v33 = vld [vmem:[%s1571_s17] ss:$16 sps:$4 sm:$0xff]   ;;  %v1172_v34 = vld [vmem:[%s1571_s17 + $0x4] ss:$16 sps:$4 sm:$0xff]   ;;  %v1173_v35 = vld [vmem:[%s1571_s17 + $0x8] ss:$16 sps:$4 sm:$0xff]   ;;  %v1024_v4 = vpack.c.bf16 (!%p912_p3), %v665_v2, %v664_v1 }
  0x8d   : > { %947 = vmatprep.subr.bf16.mxu1 %v1151_v14  ;;  %v1175_v36 = vld [vmem:[%s1571_s17 + $0xc] ss:$16 sps:$4 sm:$0xff]   ;;  %580 = vmatprep.mubr.bf16.mxu0 %v1172_v34  ;;  %v266_v46 = vld [vmem:[#allocation2] sm:$0xff]  ;;  %v668_v10 = vld [vmem:[#allocation10 + $0x40] sm:$0xff] (!%p912_p3) }
  0x8e   : > { %621 = vmatprep.mubr.bf16.mxu1 %v1175_v36  ;;  %v267_v51 = vld [vmem:[#allocation2 + $0x8] sm:$0xff]  ;;  %v662_v60 = vld [vmem:[#allocation10 + $0x10] sm:$0xff] (!%p912_p3)  ;;  %v669_v11 = vld [vmem:[#allocation10 + $0x48] sm:$0xff] (!%p912_p3) }
  0x8f   : > { %926 = vmatpush3.bf16.msra.mxu0 %v1152_v15  ;;  %v663_v61 = vld [vmem:[#allocation10 + $0x18] sm:$0xff] (!%p912_p3)  ;;  %v666_v6 = vld [vmem:[#allocation10 + $0x30] sm:$0xff] (!%p912_p3)  ;;  %v1032_v12 = vpack.c.bf16 (!%p912_p3), %v669_v11, %v668_v10 }
  0x90   : > { %948 = vmatpush3.bf16.msra.mxu1 %v1153_v16  ;;  %927 = vmatprep.subr.bf16.mxu0 %v1154_v17  ;;  %v1020_v63 = vpack.c.bf16 (!%p912_p3), %v663_v61, %v662_v60  ;;  %v667_v7 = vld [vmem:[#allocation10 + $0x38] sm:$0xff] (!%p912_p3)  ;;  %v670_v13 = vld [vmem:[#allocation10 + $0x50] sm:$0xff] (!%p912_p3)  ;;  %v672_v16 = vld [vmem:[#allocation10 + $0x60] sm:$0xff] (!%p912_p3) }
  0x91   : > { %949 = vmatprep.subr.bf16.mxu1 %v1155_v18  ;;  %v1028_v8 = vpack.c.bf16 (!%p912_p3), %v667_v7, %v666_v6  ;;  %v671_v14 = vld [vmem:[#allocation10 + $0x58] sm:$0xff] (!%p912_p3)  ;;  %v673_v17 = vld [vmem:[#allocation10 + $0x68] sm:$0xff] (!%p912_p3) }
  0x92   : > { %v1036_v15 = vpack.c.bf16 (!%p912_p3), %v671_v14, %v670_v13  ;;  %v1040_v18 = vpack.c.bf16 (!%p912_p3), %v673_v17, %v672_v16 }
  0x93   : > { %928 = vmatpush3.bf16.msra.mxu0 %v1156_v19  ;;  %v674_v19 = vld [vmem:[#allocation10 + $0x70] sm:$0xff] (!%p912_p3) }
  0x94   : > { %950 = vmatpush3.bf16.msra.mxu1 %v1157_v20  ;;  %929 = vmatprep.subr.bf16.mxu0 %v1158_v21  ;;  %v1177_v9 = vpop.eup (!%p912_p3), %1176  ;;  %v675_v20 = vld [vmem:[#allocation10 + $0x78] sm:$0xff] (!%p912_p3) }
  0x95   : > { %951 = vmatprep.subr.bf16.mxu1 %v1159_v22  ;;  %1048 = vpush (!%p912_p3), %v1177_v9  ;;  %v1044_v21 = vpack.c.bf16 (!%p912_p3), %v675_v20, %v674_v19 }
  0x97   : > { %930 = vmatpush3.bf16.msra.mxu0 %v1160_v23 }
  0x98   : > { %952 = vmatpush3.bf16.msra.mxu1 %v1161_v24  ;;  %931 = vmatprep.subr.bf16.mxu0 %v1162_v25 }
  0x99   : > { %953 = vmatprep.subr.bf16.mxu1 %v1163_v26 }
  0x9b   : > { %932 = vmatpush3.bf16.msra.mxu0 %v1164_v27 }
  0x9c   : > { %954 = vmatpush3.bf16.msra.mxu1 %v1165_v28  ;;  %933 = vmatprep.subr.bf16.mxu0 %v1166_v29 }
  0x9d   : > { %955 = vmatprep.subr.bf16.mxu1 %v1167_v30 }
  0x9f   : > { %934 = vmatpush3.bf16.msra.mxu0 %v1168_v31 }
  0xa0   : > { %956 = vmatpush3.bf16.msra.mxu1 %v1169_v32  ;;  %1017 = vmatprep.subr.bf16.mxu0 (!%p912_p3), %v1016_v62 }
  0xa2   : > { %581 = vmatmul.mubr.bf16.vlgmr.msra.gmra.mrb[0].mxu0 %v1170_v33 }
  0xa3   : > { %622 = vmatmul.mubr.bf16.vlgmr.msra.gmra.mrb[0].mxu1 %v1173_v35  ;;  %1019 = vmatpush3.bf16.msra.mxu0 (!%p912_p3), %v1016_v62 }
  0xa4   : > { %1021 = vmatprep.subr.bf16.mxu0 (!%p912_p3), %v1020_v63 }
  0xa7   : > { %1023 = vmatpush3.bf16.msra.mxu0 (!%p912_p3), %v1020_v63 }
  0xa8   : > { %1025 = vmatprep.subr.bf16.mxu0 (!%p912_p3), %v1024_v4 }
  0xab   : > { %1027 = vmatpush3.bf16.msra.mxu0 (!%p912_p3), %v1024_v4 }
  0xac   : > { %1029 = vmatprep.subr.bf16.mxu0 (!%p912_p3), %v1028_v8 }
  0xaf   : > { %1031 = vmatpush3.bf16.msra.mxu0 (!%p912_p3), %v1028_v8 }
  0xb0   : > { %1033 = vmatprep.subr.bf16.mxu0 (!%p912_p3), %v1032_v12 }
  0xb3   : > { %1035 = vmatpush3.bf16.msra.mxu0 (!%p912_p3), %v1032_v12 }
  0xb4   : > { %1037 = vmatprep.subr.bf16.mxu0 (!%p912_p3), %v1036_v15 }
  0xb7   : > { %1039 = vmatpush3.bf16.msra.mxu0 (!%p912_p3), %v1036_v15 }
  0xb8   : > { %1041 = vmatprep.subr.bf16.mxu0 (!%p912_p3), %v1040_v18 }
  0xbb   : > { %1043 = vmatpush3.bf16.msra.mxu0 (!%p912_p3), %v1040_v18 }
  0xbc   : > { %1045 = vmatprep.subr.bf16.mxu0 (!%p912_p3), %v1044_v21 }
  0xbf   : > { %1047 = vmatpush3.bf16.msra.mxu0 (!%p912_p3), %v1044_v21 }
  0xc6   : > { %s1049_s20 = spop (!%p912_p3), %1048 }
  0xc7   : > { %v655_v26 = vstv (!%p912_p3), %s1049_s20 }
 0x175   : > { %v935_v37 = vpop.f32.mrb[0].mxu0 }
 0x176   : > { %v957_v38 = vpop.f32.mrb[0].mxu1  ;;  %v936_v39 = vpop.f32.mrb[1].mxu0 }
 0x177   : > { %v937_v40 = vadd.f32 %v936_v39, %v935_v37  ;;  %v958_v41 = vpop.f32.mrb[1].mxu1  ;;  %v938_v42 = vpop.f32.mrb[2].mxu0 }
 0x178   : > { %v959_v43 = vadd.f32 %v958_v41, %v957_v38  ;;  %v960_v44 = vpop.f32.mrb[2].mxu1  ;;  %v939_v45 = vpop.f32.mrb[3].mxu0 }
 0x179   : > { %v940_v47 = vadd.f32 %v939_v45, %v938_v42  ;;  %v961_v48 = vpop.f32.mrb[3].mxu1 }
 0x17a   : > { %v624_v49 = vadd.f32 %v959_v43, %v937_v40  ;;  %v962_v50 = vadd.f32 %v961_v48, %v960_v44  ;;  %637 = sbr.rel (%p912_p3) target bundleno = 769 (0x301), region = 52 }
 0x17c   : > { %v630_v52 = vadd.f32 %v624_v49, %v266_v46  ;;  %v627_v53 = vadd.f32 %v962_v50, %v940_v47 }
 0x17e   : > { %632 = vst [vmem:[#allocation2] sm:$0xff] %v630_v52  ;;  %v631_v54 = vadd.f32 %v627_v53, %v267_v51 }
 0x180   : > { %633 = vst [vmem:[#allocation2 + $0x8] sm:$0xff] %v631_v54 }
 0x185   : > { %v638_v55 = vld [vmem:[#allocation2] sm:$0xff] }
 0x186   : > { %v640_v58 = vmul.f32 %v638_v55, %v638_v55 }
 0x187   : > { %v1626_v56 = vld [vmem:[#allocation2 + $0x8] sm:$0xff] }
 0x188   : > { %642 = vadd.xlane.f32.xlu0 %v640_v58  ;;  %v641_v0 = vmul.f32 %v1626_v56, %v1626_v56 }
 0x18c   : > { %644 = vadd.xlane.f32.xlu0 %v641_v0 }
 0x215   : > { %v643_v22 = vpop.xlane.xlu0 %642 }
 0x216   : > { %v646_v23 = vadd.f32 1e-12, %v643_v22 }
 0x218   : > { %1178 = vrsqrt.f32 %v646_v23 }
 0x219   : > { %v645_v24 = vpop.xlane.xlu0 %644 }
 0x21a   : > { %v647_v25 = vadd.f32 1e-12, %v645_v24 }
 0x21c   : > { %1180 = vrsqrt.f32 %v647_v25 }
 0x222   : > { %v1179_v27 = vpop.eup %1178 }
 0x223   : > { %v656_v28 = vmul.f32 %v1179_v27, %v655_v26 }
 0x225   : > { %v658_v29 = vmul.f32 %v656_v28, %v638_v55 }
 0x226   : > { %v1181_v30 = vpop.eup %1180 }
 0x227   : > { %v657_v31 = vmul.f32 %v1181_v30, %v655_v26  ;;  %1013 = vmatprep.mubr.f32.mxu0 %v658_v29 }
 0x229   : > { %v659_v32 = vmul.f32 %v657_v31, %v1626_v56 }
 0x22b   : > { %1014 = vmatmul.mubr.f32.vlgmr.msra.gmra.mrb[0].mxu0 %v659_v32 }
 0x2fe   : > { %v1015_v33 = vpop.f32.mrb[0].mxu0 }
 0x2ff   : > { %752 = vst [vmem:[#allocation11 + $0x8] sm:$0xff] %v1015_v33  ;;  %v742_v34 = vpop.f32.mrb[1].mxu0 }
 0x300   : > { %751 = vst [vmem:[#allocation11] sm:$0xff] %v742_v34 }
 0x301 PF: > { %p1076_p6 = scmp.eq.s32.totalorder %s1431_s0, 1  ;;  %s1371_s25 = smov [#allocation11]  }
 0x302   : > { %s762_s28 = sshll.u32 %s1371_s25, 4  ;;  %s763_s28 = int_to_ptr.vmem [resolvable:$true] %s762_s28 }
 0x303   : > { %s1270_s9 = scalar_lea.vmem %s763_s28, 256  ;;  %p1277_p0 = scmp.lt.s32.totalorder %s763_s28, %s763_s28 }
 0x304   : > { %p1271_p12 = scmp.ne.s32.totalorder %s763_s28, %s1270_s9  ;;  %p1278_p4 = scmp.lt.s32.totalorder %s1270_s9, %s1270_s9 }
 0x306   : > { %p1272_p1 = pnand %p1271_p12, %p1076_p6  ;;  %p1279_p7 = por %p1278_p4, %p1277_p0 }
 0x308   : > { %p1273_p2 = pneg %p1272_p1 }
 0x30a   : > { %p1280_p9 = pnand %p1279_p7, %p1273_p2 }
 0x30c   : > { %1283 = shalt.err (!%p1280_p9)
}
 0x30d   : > { %s1284_s11 = scalar_lea.hbm %s1676_s4, 256 }
 0x30e   : > { %p1285_p11 = scmp.ne.s32.totalorder %s1676_s4, %s1284_s11  ;;  %p1290_p10 = scmp.lt.u32.totalorder %s1284_s11, %s1676_s4 }
 0x310   : > { %p1286_p5 = pnand %p1285_p11, %p1076_p6 }
 0x312   : > { %p1287_p8 = pneg %p1286_p5 }
 0x314   : > { %p1292_p13 = pnand %p1290_p10, %p1287_p8 }
 0x316   : > { %1295 = shalt.err (!%p1292_p13)
}
 0x317   : > { %s1372_s16 = smov 128   ;;  %s1373_s26 = smov 8  }
 0x318   : > { %1059 = dma.vmem_to_hbm [thread:$0]  (%p1076_p6), %s763_s28, 256, %s1676_s4, [#allocation7], %s1372_s16, %s1372_s16, %s1373_s26  }
 0x319   : > { %1333 = dma.done.wait (%p1076_p6), [#allocation7], 256  }
 0x31a   : > { %1335 = vsyncadd (%p1076_p6), [#allocation7], 4294967040 }
 0x31b PF: > { %s22_s22 = sadd.s32 1, %s1358_s22   ;;  %s1692_s17 = smov %s1342_s18 }
 0x31c   : > { %p19_p3 = scmp.ge.s32.totalorder %s22_s22, 4   ;;  %s1693_s18 = smov %s1346_s19 }
 0x31d   : > { %s1694_s19 = smov %s1498_s10  ;;  %s1695_s20 = smov %s1354_s21 }
 0x31e   : > { %s1696_s21 = smov %s1698_s30  ;;  %21 = sbr.rel (!%p19_p3) target bundleno = 10 (0xa), region = 95 }
 0x325   :  { %778 = vsyncpa [#allocation6], 1 }
 0x326   :  { %780 = vsyncpa [#allocation6 + $0x1], 1 }
 0x327   :  { %781 = vsyncpa [#allocation9], 1 }
 0x328   :  { %783 = vsyncpa [#allocation9 + $0x1], 1 }
 0x329   :  { %784 = vsyncpa [#allocation7], 1 }
 0x32a   :  { %786 = vsyncpa [#allocation7 + $0x1], 1 }

</bundles_post_ra>
